<compile_context>
chip_gen: v5e
topology: v5e:2x2
jax: 0.10.0
libtpu: 0.0.40
codegen_flags: <defaults>
</compile_context>

<pallas_src>
import math
import functools

import jax
import jax.numpy as jnp
from jax import lax
from jax.experimental import pallas as pl
from jax.experimental.pallas import tpu as pltpu


_TILE_TARGET_BYTES = 1 << 20          # aim for ~1 MiB output tiles per grid step
_MAX_TOKEN_TILE = 1024                # upper bound on tokens per grid step
_MAX_GATHER_TILE = 512                # bound on concurrent row DMAs per step
_SINGLE_BUFFER_TABLE_BYTES = 4 << 20  # single-buffer resident tables above this
_VMEM_HEADROOM_FRACTION = 0.75        # of physical VMEM usable for table + tiles
_RESIDENT_MARGIN_BYTES = 2 << 20      # slack for compiler-internal scratch
_MAX_IDS_PER_CALL = 64 * 1024         # keep scalar-prefetched ids well under SMEM


def _vmem_capacity_bytes():
    """Per-generation VMEM size (128 MiB v5e/v6e, 64 MiB per-TC v7x)."""
    try:
        info = pltpu.get_tpu_info()
        for attr in ("vmem_capacity_bytes", "vmem_size_bytes", "vmem_bytes"):
            v = getattr(info, attr, None)
            if v:
                return int(v)
    except Exception:
        pass
    return 64 * 1024 * 1024  # conservative fallback: v7x per-TensorCore VMEM


def _choose_tile(N, D, itemsize, requested, cap):
    """Tokens per grid step: multiple of 8 (or == N when N < 8), scaled with D."""
    if requested is not None:
        T = max(1, int(requested))
    else:
        T = max(8, _TILE_TARGET_BYTES // max(1, D * itemsize))
    T = min(T, cap)
    if N < 8:
        return N                          # single block equal to the full (ragged) dim
    return max(8, (min(T, N) // 8) * 8)   # multiple of 8, never exceeding N


# ---------------------------------------------------------------------------
# Path A: VMEM-resident table; rows gathered in groups of 8 -> dense stores.
# ---------------------------------------------------------------------------
def _resident_kernel(ids_smem, table_ref, out_ref, *, tokens_per_tile, scale_factor):
    # ids_smem : (n_tiles*T,) int32 token ids, scalar-prefetched into SMEM
    # table_ref: (V, D) embedding table, VMEM-resident (constant index_map)
    # out_ref  : (T, D) output tile for this grid step
    T = tokens_per_tile
    base = pl.program_id(0) * T
    n_groups = T // 8
    rem = T % 8

    def emit_group(row_start, n_rows):
        rows = [table_ref[pl.ds(ids_smem[base + row_start + j], 1), :]
                for j in range(n_rows)]
        block = jnp.concatenate(rows, axis=0) if n_rows > 1 else rows[0]
        if scale_factor is not None:
            # one f32 upcast + multiply per dense block, not per row
            block = block.astype(jnp.float32) * scale_factor
        out_ref[pl.ds(row_start, n_rows), :] = block.astype(out_ref.dtype)

    if n_groups > 0:
        if n_groups <= 8:
            for g in range(n_groups):          # tiny static unroll
                emit_group(g * 8, 8)
        else:
            unroll = 8 if n_groups % 8 == 0 else 1

            def body(g, carry):
                emit_group(pl.multiple_of(g * 8, 8), 8)
                return carry

            lax.fori_loop(0, n_groups, body, None, unroll=unroll)

    if rem:
        emit_group(n_groups * 8, rem)          # single masked tail store (< 8 rows)


# ---------------------------------------------------------------------------
# Path B: table stays in HBM; row DMAs land directly in the output tile.
# ---------------------------------------------------------------------------
def _gather_kernel(ids_smem, table_hbm, out_ref, sem, *, tokens_per_tile, scale_factor):
    # ids_smem : (n_tiles*T,) int32 token ids in SMEM
    # table_hbm: (V, D) embedding table, left in HBM (memory_space=pl.ANY)
    # out_ref  : (T, D) output tile (DMA destination; Pallas writes it back)
    # sem      : (1,) DMA semaphore
    T = tokens_per_tile
    base = pl.program_id(0) * T
    unroll = 8 if T % 8 == 0 else 1

    def start_one(t, carry):
        tok = ids_smem[base + t]
        pltpu.make_async_copy(
            table_hbm.at[pl.ds(tok, 1), :],
            out_ref.at[pl.ds(t, 1), :],
            sem.at[0],
        ).start()
        return carry

    def wait_one(t, carry):
        # Same (1, D) descriptor shape as each start -> byte counts match exactly,
        # so T waits consume exactly the T row-copy completions (no dummy
        # aggregate-wait byte-count mismatch).
        pltpu.make_async_copy(
            table_hbm.at[pl.ds(0, 1), :],
            out_ref.at[pl.ds(0, 1), :],
            sem.at[0],
        ).wait()
        return carry

    lax.fori_loop(0, T, start_one, None, unroll=unroll)   # T concurrent row DMAs
    lax.fori_loop(0, T, wait_one, None, unroll=unroll)

    if scale_factor is not None:
        out_ref[...] = (out_ref[...].astype(jnp.float32)
                        * scale_factor).astype(out_ref.dtype)


# ---------------------------------------------------------------------------
# Wrapper (== Embeddings.forward)
# ---------------------------------------------------------------------------
def _embed_flat(ids, table, *, scale_factor, token_tile, force_gather):
    V, D = table.shape
    itemsize = jnp.dtype(table.dtype).itemsize
    N = int(ids.shape[0])

    vmem_cap = _vmem_capacity_bytes()
    usable = int(vmem_cap * _VMEM_HEADROOM_FRACTION)

    table_bytes = V * D * itemsize
    single_buffer_table = table_bytes >= _SINGLE_BUFFER_TABLE_BYTES
    effective_table_bytes = table_bytes if single_buffer_table else 2 * table_bytes

    T = _choose_tile(N, D, itemsize, token_tile, _MAX_TOKEN_TILE)

    use_resident = not force_gather
    if use_resident:
        avail_out = usable - effective_table_bytes - _RESIDENT_MARGIN_BYTES
        t_fit = avail_out // (2 * D * itemsize) if avail_out > 0 else 0
        if t_fit < min(T, 8):
            use_resident = False               # table does not fit this chip's VMEM
        elif t_fit < T:
            T = max(8, (int(t_fit) // 8) * 8)  # shrink tile to fit beside the table

    if not use_resident:
        T = max(1, min(T, _MAX_GATHER_TILE))

    n_tiles = -(-N // T)
    n_pad = n_tiles * T
    if n_pad != N:
        ids = jnp.pad(ids, (0, n_pad - N))     # pad only the tiny id vector;
                                               # the (N, D) output stays unpadded
    out_shape = jax.ShapeDtypeStruct((N, D), table.dtype)

    if use_resident:
        table_spec_kwargs = {}
        if single_buffer_table:
            # Constant-index table never refetches; single-buffer it so large
            # tables cost 1x (not 2x) VMEM (critical on v7x's 64 MiB per-TC).
            table_spec_kwargs["pipeline_mode"] = pl.Buffered(1)
        vmem_limit = effective_table_bytes + 2 * T * D * itemsize + _RESIDENT_MARGIN_BYTES
        vmem_limit = int(min(max(vmem_limit, 32 << 20), vmem_cap - (4 << 20)))

        kernel = functools.partial(
            _resident_kernel, tokens_per_tile=T, scale_factor=scale_factor)
        return pl.pallas_call(
            kernel,
            out_shape=out_shape,
            grid_spec=pltpu.PrefetchScalarGridSpec(
                num_scalar_prefetch=1,                         # ids -> SMEM
                grid=(n_tiles,),
                in_specs=[pl.BlockSpec((V, D), lambda g, ids_ref: (0, 0),
                                       **table_spec_kwargs)],
                out_specs=pl.BlockSpec((T, D), lambda g, ids_ref: (g, 0)),
            ),
            compiler_params=pltpu.CompilerParams(
                dimension_semantics=("parallel",),             # each tile written once
                vmem_limit_bytes=vmem_limit,
            ),
        )(ids, table)

    kernel = functools.partial(
        _gather_kernel, tokens_per_tile=T, scale_factor=scale_factor)
    return pl.pallas_call(
        kernel,
        out_shape=out_shape,
        grid_spec=pltpu.PrefetchScalarGridSpec(
            num_scalar_prefetch=1,                             # ids -> SMEM
            grid=(n_tiles,),
            in_specs=[pl.BlockSpec(memory_space=pl.ANY)],      # table stays in HBM
            out_specs=pl.BlockSpec((T, D), lambda g, ids_ref: (g, 0)),
            scratch_shapes=[pltpu.SemaphoreType.DMA((1,))],
        ),
        compiler_params=pltpu.CompilerParams(
            dimension_semantics=("parallel",),   # no cross-step state -> megacore-safe
        ),
    )(ids, table)


def embeddings_forward(x, table, *, scale=False, token_tile=None, force_gather=False):
    """Embedding lookup; equivalent to nn.Embedding(x) (* sqrt(D) if scale)."""
    orig_shape = x.shape
    V, D = table.shape

    # PyTorch raises on out-of-range ids; we clamp instead of reading OOB.
    ids = jnp.clip(x.reshape(-1).astype(jnp.int32), 0, V - 1)
    N = int(ids.shape[0])
    scale_factor = float(math.sqrt(D)) if scale else None

    # Chunk very long sequences so the scalar-prefetched ids always fit in SMEM.
    if N > _MAX_IDS_PER_CALL:
        parts = []
        for s in range(0, N, _MAX_IDS_PER_CALL):
            parts.append(_embed_flat(ids[s:s + _MAX_IDS_PER_CALL], table,
                                     scale_factor=scale_factor,
                                     token_tile=token_tile,
                                     force_gather=force_gather))
        out = jnp.concatenate(parts, axis=0)
    else:
        out = _embed_flat(ids, table, scale_factor=scale_factor,
                          token_tile=token_tile, force_gather=force_gather)

    return out.reshape(*orig_shape, D)


def make_embedding_table(key, vocab_size, embedding_dim, padding_idx=1):
    """Deterministic init mirroring nn.Embedding: N(0,1) rows, padding row zeroed."""
    table = jax.random.normal(key, (vocab_size, embedding_dim), dtype=jnp.float32)
    table = table.at[padding_idx].set(0.0)
    return table


if __name__ == "__main__":
    # Small shapes consistent with the module: vocab=32, embedding_dim=64, batch=2, seq=8
    vocab_size, embedding_dim, padding_idx = 32, 64, 1
    batch, seq = 2, 8

    key = jax.random.PRNGKey(0)
    k_tab, k_ids = jax.random.split(key)

    table = make_embedding_table(k_tab, vocab_size, embedding_dim, padding_idx)
    x = jax.random.randint(k_ids, (batch, seq), 0, vocab_size, dtype=jnp.int32)
    x = x.at[0, 0].set(padding_idx)  # make sure the padding index appears

    # Plain-JAX references
    ref = jnp.take(table, x.reshape(-1), axis=0).reshape(batch, seq, embedding_dim)
    ref_scaled = ref * math.sqrt(embedding_dim)

    # Path A: VMEM-resident table, dense (8, D) grouped stores, scale=True.
    out1 = jax.block_until_ready(embeddings_forward(x, table, scale=True))
    assert out1.shape == (batch, seq, embedding_dim)
    assert jnp.allclose(out1, ref_scaled, atol=1e-5, rtol=1e-6)
    assert jnp.allclose(out1[0, 0], 0.0)  # padding_idx row stays zero

    # Path A with a ragged token count (masked partial output block, no pad/slice copy).
    x_rag = x.reshape(-1)[:15].reshape(3, 5)
    ref_rag = jnp.take(table, x_rag.reshape(-1), axis=0).reshape(3, 5, embedding_dim)
    out_rag = jax.block_until_ready(embeddings_forward(x_rag, table, scale=False))
    assert out_rag.shape == (3, 5, embedding_dim)
    assert jnp.allclose(out_rag, ref_rag, atol=1e-6, rtol=1e-6)

    # Path B: HBM table, row DMAs land directly in the output tile (forced), no scale.
    out2 = jax.block_until_ready(
        embeddings_forward(x, table, scale=False, force_gather=True, token_tile=8))
    assert out2.shape == (batch, seq, embedding_dim)
    assert jnp.allclose(out2, ref, atol=1e-6, rtol=1e-6)
    assert jnp.allclose(out2[0, 0], 0.0)

    # Path B with scaling (single in-place scale on the output tile after the DMAs).
    out3 = jax.block_until_ready(
        embeddings_forward(x, table, scale=True, force_gather=True))
    assert jnp.allclose(out3, ref_scaled, atol=1e-5, rtol=1e-6)

    print("KERNEL_OK")
</pallas_src>

<mosaic_0001>
module attributes {stable_mosaic.version = 11 : i64} {
  func.func @_resident_kernel(%arg0: i32, %arg1: memref<16xi32, #tpu.memory_space<smem>>, %arg2: memref<32x64xf32, #tpu.memory_space<vmem>>, %arg3: memref<16x64xf32, #tpu.memory_space<vmem>>) attributes {dimension_semantics = [#tpu.dimension_semantics<parallel>], iteration_bounds = array<i64: 1>, scalar_prefetch = 1 : i64, scratch_operands = 0 : i64, tpu.core_type = #tpu.core_type<tc>, window_params = [{pipeline_mode = #tpu.pipeline_mode<synchronous>, transform_indices = @transform_0, window_bounds = array<i64: 32, 64>}, {transform_indices = @transform_1, window_bounds = array<i64: 16, 64>}]} {
    %c16_i32 = arith.constant 16 : i32
    %0 = arith.muli %arg0, %c16_i32 : i32
    %c0_i32 = arith.constant 0 : i32
    %1 = arith.addi %0, %c0_i32 : i32
    %c0_i32_0 = arith.constant 0 : i32
    %2 = arith.addi %1, %c0_i32_0 : i32
    %3 = arith.index_cast %2 : i32 to index
    %4 = memref.load %arg1[%3] : memref<16xi32, #tpu.memory_space<smem>>
    %5 = arith.index_cast %4 : i32 to index
    %c0 = arith.constant 0 : index
    %6 = vector.load %arg2[%5, %c0] : memref<32x64xf32, #tpu.memory_space<vmem>>, vector<1x64xf32>
    %c0_i32_1 = arith.constant 0 : i32
    %7 = arith.addi %0, %c0_i32_1 : i32
    %c1_i32 = arith.constant 1 : i32
    %8 = arith.addi %7, %c1_i32 : i32
    %9 = arith.index_cast %8 : i32 to index
    %10 = memref.load %arg1[%9] : memref<16xi32, #tpu.memory_space<smem>>
    %11 = arith.index_cast %10 : i32 to index
    %c0_2 = arith.constant 0 : index
    %12 = vector.load %arg2[%11, %c0_2] : memref<32x64xf32, #tpu.memory_space<vmem>>, vector<1x64xf32>
    %c0_i32_3 = arith.constant 0 : i32
    %13 = arith.addi %0, %c0_i32_3 : i32
    %c2_i32 = arith.constant 2 : i32
    %14 = arith.addi %13, %c2_i32 : i32
    %15 = arith.index_cast %14 : i32 to index
    %16 = memref.load %arg1[%15] : memref<16xi32, #tpu.memory_space<smem>>
    %17 = arith.index_cast %16 : i32 to index
    %c0_4 = arith.constant 0 : index
    %18 = vector.load %arg2[%17, %c0_4] : memref<32x64xf32, #tpu.memory_space<vmem>>, vector<1x64xf32>
    %c0_i32_5 = arith.constant 0 : i32
    %19 = arith.addi %0, %c0_i32_5 : i32
    %c3_i32 = arith.constant 3 : i32
    %20 = arith.addi %19, %c3_i32 : i32
    %21 = arith.index_cast %20 : i32 to index
    %22 = memref.load %arg1[%21] : memref<16xi32, #tpu.memory_space<smem>>
    %23 = arith.index_cast %22 : i32 to index
    %c0_6 = arith.constant 0 : index
    %24 = vector.load %arg2[%23, %c0_6] : memref<32x64xf32, #tpu.memory_space<vmem>>, vector<1x64xf32>
    %c0_i32_7 = arith.constant 0 : i32
    %25 = arith.addi %0, %c0_i32_7 : i32
    %c4_i32 = arith.constant 4 : i32
    %26 = arith.addi %25, %c4_i32 : i32
    %27 = arith.index_cast %26 : i32 to index
    %28 = memref.load %arg1[%27] : memref<16xi32, #tpu.memory_space<smem>>
    %29 = arith.index_cast %28 : i32 to index
    %c0_8 = arith.constant 0 : index
    %30 = vector.load %arg2[%29, %c0_8] : memref<32x64xf32, #tpu.memory_space<vmem>>, vector<1x64xf32>
    %c0_i32_9 = arith.constant 0 : i32
    %31 = arith.addi %0, %c0_i32_9 : i32
    %c5_i32 = arith.constant 5 : i32
    %32 = arith.addi %31, %c5_i32 : i32
    %33 = arith.index_cast %32 : i32 to index
    %34 = memref.load %arg1[%33] : memref<16xi32, #tpu.memory_space<smem>>
    %35 = arith.index_cast %34 : i32 to index
    %c0_10 = arith.constant 0 : index
    %36 = vector.load %arg2[%35, %c0_10] : memref<32x64xf32, #tpu.memory_space<vmem>>, vector<1x64xf32>
    %c0_i32_11 = arith.constant 0 : i32
    %37 = arith.addi %0, %c0_i32_11 : i32
    %c6_i32 = arith.constant 6 : i32
    %38 = arith.addi %37, %c6_i32 : i32
    %39 = arith.index_cast %38 : i32 to index
    %40 = memref.load %arg1[%39] : memref<16xi32, #tpu.memory_space<smem>>
    %41 = arith.index_cast %40 : i32 to index
    %c0_12 = arith.constant 0 : index
    %42 = vector.load %arg2[%41, %c0_12] : memref<32x64xf32, #tpu.memory_space<vmem>>, vector<1x64xf32>
    %c0_i32_13 = arith.constant 0 : i32
    %43 = arith.addi %0, %c0_i32_13 : i32
    %c7_i32 = arith.constant 7 : i32
    %44 = arith.addi %43, %c7_i32 : i32
    %45 = arith.index_cast %44 : i32 to index
    %46 = memref.load %arg1[%45] : memref<16xi32, #tpu.memory_space<smem>>
    %47 = arith.index_cast %46 : i32 to index
    %c0_14 = arith.constant 0 : index
    %48 = vector.load %arg2[%47, %c0_14] : memref<32x64xf32, #tpu.memory_space<vmem>>, vector<1x64xf32>
    %49 = tpu.concatenate %6, %12, %18, %24, %30, %36, %42, %48 in 0 : vector<1x64xf32>, vector<1x64xf32>, vector<1x64xf32>, vector<1x64xf32>, vector<1x64xf32>, vector<1x64xf32>, vector<1x64xf32>, vector<1x64xf32> -> vector<8x64xf32>
    %cst = arith.constant 8.000000e+00 : f32
    %50 = vector.broadcast %cst : f32 to vector<8x64xf32>
    %51 = arith.mulf %49, %50 : vector<8x64xf32>
    %c0_15 = arith.constant 0 : index
    %c0_16 = arith.constant 0 : index
    %52 = vector.load %arg3[%c0_15, %c0_16] : memref<16x64xf32, #tpu.memory_space<vmem>>, vector<8x64xf32>
    tpu.vector_store %arg3[%c0_15, %c0_16], %51 {strides = array<i32>} : memref<16x64xf32, #tpu.memory_space<vmem>>, vector<8x64xf32>,
    %c8_i32 = arith.constant 8 : i32
    %53 = arith.addi %0, %c8_i32 : i32
    %c0_i32_17 = arith.constant 0 : i32
    %54 = arith.addi %53, %c0_i32_17 : i32
    %55 = arith.index_cast %54 : i32 to index
    %56 = memref.load %arg1[%55] : memref<16xi32, #tpu.memory_space<smem>>
    %57 = arith.index_cast %56 : i32 to index
    %c0_18 = arith.constant 0 : index
    %58 = vector.load %arg2[%57, %c0_18] : memref<32x64xf32, #tpu.memory_space<vmem>>, vector<1x64xf32>
    %c8_i32_19 = arith.constant 8 : i32
    %59 = arith.addi %0, %c8_i32_19 : i32
    %c1_i32_20 = arith.constant 1 : i32
    %60 = arith.addi %59, %c1_i32_20 : i32
    %61 = arith.index_cast %60 : i32 to index
    %62 = memref.load %arg1[%61] : memref<16xi32, #tpu.memory_space<smem>>
    %63 = arith.index_cast %62 : i32 to index
    %c0_21 = arith.constant 0 : index
    %64 = vector.load %arg2[%63, %c0_21] : memref<32x64xf32, #tpu.memory_space<vmem>>, vector<1x64xf32>
    %c8_i32_22 = arith.constant 8 : i32
    %65 = arith.addi %0, %c8_i32_22 : i32
    %c2_i32_23 = arith.constant 2 : i32
    %66 = arith.addi %65, %c2_i32_23 : i32
    %67 = arith.index_cast %66 : i32 to index
    %68 = memref.load %arg1[%67] : memref<16xi32, #tpu.memory_space<smem>>
    %69 = arith.index_cast %68 : i32 to index
    %c0_24 = arith.constant 0 : index
    %70 = vector.load %arg2[%69, %c0_24] : memref<32x64xf32, #tpu.memory_space<vmem>>, vector<1x64xf32>
    %c8_i32_25 = arith.constant 8 : i32
    %71 = arith.addi %0, %c8_i32_25 : i32
    %c3_i32_26 = arith.constant 3 : i32
    %72 = arith.addi %71, %c3_i32_26 : i32
    %73 = arith.index_cast %72 : i32 to index
    %74 = memref.load %arg1[%73] : memref<16xi32, #tpu.memory_space<smem>>
    %75 = arith.index_cast %74 : i32 to index
    %c0_27 = arith.constant 0 : index
    %76 = vector.load %arg2[%75, %c0_27] : memref<32x64xf32, #tpu.memory_space<vmem>>, vector<1x64xf32>
    %c8_i32_28 = arith.constant 8 : i32
    %77 = arith.addi %0, %c8_i32_28 : i32
    %c4_i32_29 = arith.constant 4 : i32
    %78 = arith.addi %77, %c4_i32_29 : i32
    %79 = arith.index_cast %78 : i32 to index
    %80 = memref.load %arg1[%79] : memref<16xi32, #tpu.memory_space<smem>>
    %81 = arith.index_cast %80 : i32 to index
    %c0_30 = arith.constant 0 : index
    %82 = vector.load %arg2[%81, %c0_30] : memref<32x64xf32, #tpu.memory_space<vmem>>, vector<1x64xf32>
    %c8_i32_31 = arith.constant 8 : i32
    %83 = arith.addi %0, %c8_i32_31 : i32
    %c5_i32_32 = arith.constant 5 : i32
    %84 = arith.addi %83, %c5_i32_32 : i32
    %85 = arith.index_cast %84 : i32 to index
    %86 = memref.load %arg1[%85] : memref<16xi32, #tpu.memory_space<smem>>
    %87 = arith.index_cast %86 : i32 to index
    %c0_33 = arith.constant 0 : index
    %88 = vector.load %arg2[%87, %c0_33] : memref<32x64xf32, #tpu.memory_space<vmem>>, vector<1x64xf32>
    %c8_i32_34 = arith.constant 8 : i32
    %89 = arith.addi %0, %c8_i32_34 : i32
    %c6_i32_35 = arith.constant 6 : i32
    %90 = arith.addi %89, %c6_i32_35 : i32
    %91 = arith.index_cast %90 : i32 to index
    %92 = memref.load %arg1[%91] : memref<16xi32, #tpu.memory_space<smem>>
    %93 = arith.index_cast %92 : i32 to index
    %c0_36 = arith.constant 0 : index
    %94 = vector.load %arg2[%93, %c0_36] : memref<32x64xf32, #tpu.memory_space<vmem>>, vector<1x64xf32>
    %c8_i32_37 = arith.constant 8 : i32
    %95 = arith.addi %0, %c8_i32_37 : i32
    %c7_i32_38 = arith.constant 7 : i32
    %96 = arith.addi %95, %c7_i32_38 : i32
    %97 = arith.index_cast %96 : i32 to index
    %98 = memref.load %arg1[%97] : memref<16xi32, #tpu.memory_space<smem>>
    %99 = arith.index_cast %98 : i32 to index
    %c0_39 = arith.constant 0 : index
    %100 = vector.load %arg2[%99, %c0_39] : memref<32x64xf32, #tpu.memory_space<vmem>>, vector<1x64xf32>
    %101 = tpu.concatenate %58, %64, %70, %76, %82, %88, %94, %100 in 0 : vector<1x64xf32>, vector<1x64xf32>, vector<1x64xf32>, vector<1x64xf32>, vector<1x64xf32>, vector<1x64xf32>, vector<1x64xf32>, vector<1x64xf32> -> vector<8x64xf32>
    %cst_40 = arith.constant 8.000000e+00 : f32
    %102 = vector.broadcast %cst_40 : f32 to vector<8x64xf32>
    %103 = arith.mulf %101, %102 : vector<8x64xf32>
    %c8 = arith.constant 8 : index
    %c0_41 = arith.constant 0 : index
    %104 = vector.load %arg3[%c8, %c0_41] : memref<16x64xf32, #tpu.memory_space<vmem>>, vector<8x64xf32>
    tpu.vector_store %arg3[%c8, %c0_41], %103 {strides = array<i32>} : memref<16x64xf32, #tpu.memory_space<vmem>>, vector<8x64xf32>,
    return
  }
  func.func @transform_0(%arg0: i32, %arg1: memref<16xi32, #tpu.memory_space<smem>>) -> (i32, i32) {
    %c0_i32 = arith.constant 0 : i32
    %c0_i32_0 = arith.constant 0 : i32
    %c0_i32_1 = arith.constant 0 : i32
    return %c0_i32, %c0_i32_0 : i32, i32
  }
  func.func @transform_1(%arg0: i32, %arg1: memref<16xi32, #tpu.memory_space<smem>>) -> (i32, i32) {
    %c0_i32 = arith.constant 0 : i32
    %c0_i32_0 = arith.constant 0 : i32
    return %arg0, %c0_i32 : i32, i32
  }
}

</mosaic_0001>

<bundles_post_ra>
// kernel: tpu_custom_call.1
= control target key start
LH: loop header
LB: loop body
LE: loop exit
PB: predicated region body
PF: predicated region fallthrough
CT: control target
= control target key end

     0   :  { %s287_s12 = smov [#allocation3]   ;;  %s368_s0 = inlined_call_operand.hbm [shape: s32[16], index: 0, kind: input, shape index: {}]   ;;  %s369_s1 = inlined_call_operand.hbm [shape: f32[32,64], index: 1, kind: input, shape index: {}]   ;;  %s370_s2 = inlined_call_operand.hbm [shape: f32[16,64], index: 2, kind: output, shape index: {}]  }
   0x1   :  { %s8_s11 = sshll.u32 %s368_s0, 4  ;;  %s9_s11 = int_to_ptr.hbm [resolvable:$true] %s8_s11 }
   0x2   :  { %11 = dma.hbm_to_smem %s9_s11, 16, %s287_s12, [#allocation2] }
   0x3   :  { %281 = dma.done.wait [#allocation2], 16 }
   0x4   :  { %282 = vsyncadd [#allocation2], 4294967280 }
   0x5   :  { %14 = sfence }
   0x6   :  { %15 = vsyncpa [#allocation5], 0 }
   0x7   :  { %16 = vsyncpa [#allocation6], 0  ;;  %s21_s15 = sshll.u32 %s369_s1, 4  ;;  %s288_s16 = smov [#allocation4]   ;;  %s22_s15 = int_to_ptr.hbm [resolvable:$true] %s21_s15 }
   0x8   :  { %s23_s17 = sshll.u32 %s288_s16, 4  ;;  %s289_s18 = smov 128   ;;  %s24_s17 = int_to_ptr.vmem [resolvable:$true] %s23_s17 }
   0x9   :  { %s290_s19 = smov 8  }
   0xa   :  { %29 = dma.hbm_to_vmem [thread:$0]  %s22_s15, 512, %s24_s17, [#allocation5], %s289_s18, %s289_s18, %s290_s19  }
   0xb   :  { %283 = dma.done.wait [#allocation5], 512  }
   0xc   :  { %284 = vsyncadd [#allocation5], 4294966784  ;;  %s35_s0 = sld [smem:[#allocation3]]  ;;  %vm87_vm0 = vcmask 1040384   ;;  %vm89_vm1 = vcmask 1041408   ;;  %vm91_vm2 = vcmask 1042432  }
   0xd   :  { %s201_s20 = sld [smem:[#allocation3 + $0x1]]  ;;  %vm93_vm3 = vcmask 1043456   ;;  %vm95_vm4 = vcmask 1044480   ;;  %vm97_vm5 = vcmask 1045504   ;;  %vm99_vm6 = vcmask 1046528  }
   0xe   :  { %s202_s21 = sld [smem:[#allocation3 + $0x2]]  ;;  %vm102_vm7 = vcmask 523264  }
   0xf   :  { %s203_s22 = sld [smem:[#allocation3 + $0x3]] }
  0x10   :  { %s204_s23 = sld [smem:[#allocation3 + $0x4]] }
  0x11   :  { %s316_s24 = sld [smem:[#allocation3 + $0x5]] }
  0x12   :  { %s318_s1 = sld [smem:[#allocation3 + $0x6]]  ;;  %s36_s25 = scalar_lea.vmem [#allocation4], %s35_s0 }
  0x13   :  { %v37_v0 = vld [vmem:[%s36_s25] sm:$0x1]  ;;  %s320_s26 = sld [smem:[#allocation3 + $0x7]]  ;;  %s40_s27 = scalar_lea.vmem [#allocation4], %s201_s20 }
  0x14   :  { %v41_v1 = vld [vmem:[%s40_s27] sm:$0x1]  ;;  %s322_s28 = sld [smem:[#allocation3 + $0x8]]  ;;  %s44_s29 = scalar_lea.vmem [#allocation4], %s202_s21 }
  0x15   :  { %v45_v2 = vld [vmem:[%s44_s29] sm:$0x1]  ;;  %v67_v3 = vrot.slane %v41_v1, 7  ;;  %s324_s30 = sld [smem:[#allocation3 + $0x9]]  ;;  %s48_s3 = scalar_lea.vmem [#allocation4], %s203_s22 }
  0x16   :  { %v49_v4 = vld [vmem:[%s48_s3] sm:$0x1]  ;;  %v70_v5 = vrot.slane %v45_v2, 6  ;;  %s326_s4 = sld [smem:[#allocation3 + $0xa]]  ;;  %s52_s5 = scalar_lea.vmem [#allocation4], %s204_s23 }
  0x17   :  { %v53_v6 = vld [vmem:[%s52_s5] sm:$0x1]  ;;  %v73_v7 = vrot.slane %v49_v4, 5  ;;  %v88_v8 = vsel %vm87_vm0, %v37_v0, %v67_v3  ;;  %s329_s6 = sld [smem:[#allocation3 + $0xb]]  ;;  %s56_s7 = scalar_lea.vmem [#allocation4], %s316_s24 }
  0x18   :  { %v57_v9 = vld [vmem:[%s56_s7] sm:$0x1]  ;;  %v76_v10 = vrot.slane %v53_v6, 4  ;;  %v90_v11 = vsel %vm89_vm1, %v88_v8, %v70_v5  ;;  %s333_s8 = sld [smem:[#allocation3 + $0xc]]  ;;  %s60_s9 = scalar_lea.vmem [#allocation4], %s318_s1 }
  0x19   :  { %v61_v12 = vld [vmem:[%s60_s9] sm:$0x1]  ;;  %v79_v13 = vrot.slane %v57_v9, 3  ;;  %v92_v14 = vsel %vm91_vm2, %v90_v11, %v73_v7  ;;  %s337_s10 = sld [smem:[#allocation3 + $0xd]]  ;;  %s64_s11 = scalar_lea.vmem [#allocation4], %s320_s26 }
  0x1a   :  { %v65_v15 = vld [vmem:[%s64_s11] sm:$0x1]  ;;  %v82_v16 = vrot.slane %v61_v12, 2  ;;  %v94_v17 = vsel %vm93_vm3, %v92_v14, %v76_v10  ;;  %s214_s12 = sld [smem:[#allocation3 + $0xe]]  ;;  %s106_s14 = scalar_lea.vmem [#allocation4], %s322_s28 }
  0x1b   :  { %v85_v18 = vrot.slane %v65_v15, 1  ;;  %v96_v19 = vsel %vm95_vm4, %v94_v17, %v79_v13  ;;  %s342_s13 = sld [smem:[#allocation3 + $0xf]]  ;;  %v107_v21 = vld [vmem:[%s106_s14] sm:$0x1]  ;;  %s110_s15 = scalar_lea.vmem [#allocation4], %s324_s30 }
  0x1c   :  { %v98_v20 = vsel %vm97_vm5, %v96_v19, %v82_v16  ;;  %v111_v22 = vld [vmem:[%s110_s15] sm:$0x1]  ;;  %s114_s16 = scalar_lea.vmem [#allocation4], %s326_s4  ;;  %s291_s23 = smov [#allocation7]  }
  0x1d   :  { %v100_v23 = vsel %vm99_vm6, %v98_v20, %v85_v18  ;;  %v115_v24 = vld [vmem:[%s114_s16] sm:$0x1]  ;;  %v137_v25 = vrot.slane %v111_v22, 7  ;;  %s118_s17 = scalar_lea.vmem [#allocation4], %s329_s6  ;;  %s170_s24 = sshll.u32 %s291_s23, 4  ;;  %s171_s24 = int_to_ptr.vmem [resolvable:$true] %s170_s24 }
  0x1e   :  { %v101_v26 = vmul.f32 8.0, %v100_v23  ;;  %v119_v27 = vld [vmem:[%s118_s17] sm:$0x1]  ;;  %v140_v28 = vrot.slane %v115_v24, 6  ;;  %s122_s0 = scalar_lea.vmem [#allocation4], %s333_s8  ;;  %s172_s26 = sshll.u32 %s370_s2, 4  ;;  %s173_s26 = int_to_ptr.hbm [resolvable:$true] %s172_s26 }
  0x1f   :  { %v123_v29 = vld [vmem:[%s122_s0] sm:$0x1]  ;;  %v143_v30 = vrot.slane %v119_v27, 5  ;;  %v157_v31 = vsel %vm87_vm0, %v107_v21, %v137_v25  ;;  %s126_s20 = scalar_lea.vmem [#allocation4], %s337_s10 }
  0x20   :  { %103 = vst.msk [vmem:[#allocation7] sm:$0xff] %vm102_vm7, %v101_v26  ;;  %v127_v32 = vld [vmem:[%s126_s20] sm:$0x1]  ;;  %v146_v33 = vrot.slane %v123_v29, 4  ;;  %v158_v34 = vsel %vm89_vm1, %v157_v31, %v140_v28  ;;  %s130_s21 = scalar_lea.vmem [#allocation4], %s214_s12 }
  0x21   :  { %v131_v35 = vld [vmem:[%s130_s21] sm:$0x1]  ;;  %v149_v36 = vrot.slane %v127_v32, 3  ;;  %v159_v37 = vsel %vm91_vm2, %v158_v34, %v143_v30  ;;  %s134_s22 = scalar_lea.vmem [#allocation4], %s342_s13 }
  0x22   :  { %v135_v38 = vld [vmem:[%s134_s22] sm:$0x1]  ;;  %v152_v39 = vrot.slane %v131_v35, 2  ;;  %v160_v40 = vsel %vm93_vm3, %v159_v37, %v146_v33 }
  0x23   :  { %v155_v41 = vrot.slane %v135_v38, 1  ;;  %v161_v42 = vsel %vm95_vm4, %v160_v40, %v149_v36 }
  0x24   :  { %v162_v43 = vsel %vm97_vm5, %v161_v42, %v152_v39 }
  0x25   :  { %v163_v44 = vsel %vm99_vm6, %v162_v43, %v155_v41 }
  0x26   :  { %v164_v45 = vmul.f32 8.0, %v163_v44 }
  0x28   :  { %165 = vst.msk [vmem:[#allocation7 + $0x8] sm:$0xff] %vm102_vm7, %v164_v45 }
  0x29   :  { %178 = dma.vmem_to_hbm [thread:$0]  %s171_s24, 256, %s173_s26, [#allocation6], %s289_s18, %s289_s18, %s290_s19  }
  0x2a   :  { %285 = dma.done.wait [#allocation6], 256  }
  0x2b   :  { %286 = vsyncadd [#allocation6], 4294967040 }
  0x2c   :  { %183 = vsyncpa [#allocation5], 1 }
  0x2d   :  { %184 = vsyncpa [#allocation6], 1 }

</bundles_post_ra>
